<compile_context>
chip_gen: v7x
topology: tpu7x:2x2x1
jax: 0.10.0
libtpu: 0.0.40
codegen_flags: <defaults>
</compile_context>

<pallas_src>
import math

import jax
import jax.numpy as jnp
from jax import lax
from jax.experimental import pallas as pl
from jax.experimental.pallas import tpu as pltpu


def _round_up(n, m):
    return ((n + m - 1) // m) * m


def _cdiv(a, b):
    return -(-a // b)


def _mlp_kernel(x_ref,
                w1_ref, b1_ref,
                w2_ref, b2_ref,
                w3_ref, b3_ref,
                w4_ref, b4_ref,
                o_ref):
    """One batch tile of the MLP, batch-on-lanes.

    x_ref:  (TB, F) f32, natural (batch, features) layout straight from HBM.
    w1_ref: (128, F) f32 — fc1 stays f32 (trivial FLOPs, preserves precision
            of unnormalized stock features).
    w2/3/4: (out, in) in the compute dtype (bf16 on v6e/v7x, f32 on v5e).
    b1/2/3: (out, 1) in the compute dtype (epilogue dtype); b4_ref: (1, 1) f32.
    o_ref:  (1, TB) f32 — lane-dense store (batch on lanes, no masked vst).
    """
    cdt = w2_ref.dtype

    # fc1: contract the feature axis of the (TB, F) tile directly so the
    # result is (128, TB) with the batch on the lane axis — no transpose.
    h = lax.dot_general(w1_ref[...], x_ref[...],
                        (((1,), (1,)), ((), ())),
                        preferred_element_type=jnp.float32)
    h = jnp.maximum(h.astype(cdt) + b1_ref[...], 0.0)            # (128, TB)

    # fc2 + relu (epilogue in compute dtype: one cast, bias-add, ReLU)
    h = jnp.dot(w2_ref[...], h, preferred_element_type=jnp.float32)
    h = jnp.maximum(h.astype(cdt) + b2_ref[...], 0.0)            # (64, TB)

    # fc3 + relu
    h = jnp.dot(w3_ref[...], h, preferred_element_type=jnp.float32)
    h = jnp.maximum(h.astype(cdt) + b3_ref[...], 0.0)            # (32, TB)

    # fc4 (no activation) -> f32 result, lane-dense (1, TB) store
    out = jnp.dot(w4_ref[...], h, preferred_element_type=jnp.float32)
    o_ref[...] = (out + b4_ref[...]).astype(o_ref.dtype)


def _choose_tile(B, block_b):
    """128-aligned batch tile, balancing tile size vs. tile count.

    Keeps per-tile padding small (<= 127 rows) and targets >= 2 grid steps for
    moderate/large batches so both v7x TensorCores are fed; for tiny batches a
    single 128-row tile is used."""
    max_tb = max(128, _round_up(min(block_b, max(B, 1)), 128))
    n_tiles = max(1, _cdiv(max(B, 1), max_tb))
    if B > 256:
        n_tiles = max(n_tiles, 2)
    tb = _round_up(_cdiv(max(B, 1), n_tiles), 128)
    return max(128, min(tb, max_tb))


def stock_price_predictor_forward(x, params, *, compute_dtype=jnp.bfloat16,
                                  block_b=4096):
    """x: (B, input_size) f32. Returns (B, 1) f32 matching the PyTorch forward."""
    B, F = x.shape
    x = x.astype(jnp.float32)                       # no-op if already f32

    tb = _choose_tile(B, block_b)
    grid = (_cdiv(B, tb),)                          # ragged last tile: masked by Pallas

    # fc1 operands stay f32; layers 2-4 + epilogue use compute_dtype.
    w1 = params["w1"].astype(jnp.float32)
    b1 = params["b1"].astype(compute_dtype)
    w2 = params["w2"].astype(compute_dtype)
    b2 = params["b2"].astype(compute_dtype)
    w3 = params["w3"].astype(compute_dtype)
    b3 = params["b3"].astype(compute_dtype)
    w4 = params["w4"].astype(compute_dtype)
    b4 = params["b4"].astype(jnp.float32)

    def full(a):  # whole array, VMEM-resident across all grid steps
        return pl.BlockSpec(a.shape, lambda i: (0,) * a.ndim)

    operands = [w1, b1, w2, b2, w3, b3, w4, b4]
    in_specs = ([pl.BlockSpec((tb, F), lambda i: (i, 0))]        # x tile (TB, F)
                + [full(a) for a in operands])

    weight_bytes = sum(int(a.size) * a.dtype.itemsize for a in operands)
    cost = pl.CostEstimate(
        flops=2 * B * (F * 128 + 128 * 64 + 64 * 32 + 32 * 1),
        transcendentals=0,
        bytes_accessed=B * (F * 4 + 4) + weight_bytes,
    )

    out_T = pl.pallas_call(
        _mlp_kernel,
        out_shape=jax.ShapeDtypeStruct((1, B), jnp.float32),
        grid=grid,
        in_specs=in_specs,
        out_specs=pl.BlockSpec((1, tb), lambda i: (0, i)),       # lane-dense store
        compiler_params=pltpu.CompilerParams(
            dimension_semantics=("parallel",)),
        cost_estimate=cost,
    )(x, *operands)

    return jnp.transpose(out_T)                                  # (B, 1) f32


def init_params(key, input_size=12):
    """PyTorch nn.Linear default init: weight (out, in), bias (out,), both
    U(-1/sqrt(fan_in), 1/sqrt(fan_in)). Weights kept in native (out, in)
    layout (kernel computes W @ x^T); biases stored as (out, 1)."""
    dims = [(input_size, 128), (128, 64), (64, 32), (32, 1)]
    params = {}
    for i, (fan_in, fan_out) in enumerate(dims, start=1):
        key, kw, kb = jax.random.split(key, 3)
        bound = 1.0 / math.sqrt(fan_in)
        params[f"w{i}"] = jax.random.uniform(kw, (fan_out, fan_in),
                                             jnp.float32, -bound, bound)
        params[f"b{i}"] = jax.random.uniform(kb, (fan_out, 1),
                                             jnp.float32, -bound, bound)
    return params


def reference_forward(x, params):
    """Pure-JAX f32 reference matching the PyTorch module."""
    h = x
    for i in range(1, 4):
        h = jnp.maximum(h @ params[f"w{i}"].T + params[f"b{i}"].T, 0.0)
    return h @ params["w4"].T + params["b4"].T


if __name__ == "__main__":
    key = jax.random.PRNGKey(0)
    key, kx = jax.random.split(key)

    input_size = 12  # len(features) in the PyTorch script
    batch = 8
    x = jax.random.normal(kx, (batch, input_size), jnp.float32)
    params = init_params(key, input_size)

    ref = reference_forward(x, params)

    # Pure f32 path (v5e-style): tight tolerance vs. the f32 reference.
    out_f32 = jax.block_until_ready(
        stock_price_predictor_forward(x, params, compute_dtype=jnp.float32))
    assert out_f32.shape == (batch, 1)
    assert jnp.allclose(out_f32, ref, atol=1e-4, rtol=1e-4), "f32 mismatch"

    # bf16 layers-2..4 + bf16 epilogue (v6e/v7x); fc1 and accumulation stay f32.
    out_bf16 = jax.block_until_ready(
        stock_price_predictor_forward(x, params, compute_dtype=jnp.bfloat16))
    assert out_bf16.shape == (batch, 1)
    assert jnp.allclose(out_bf16, ref, atol=5e-2, rtol=5e-2), "bf16 mismatch"

    # Multi-tile grid + ragged-batch masking path (B=300 -> tb=256, grid=2).
    key, kx2 = jax.random.split(key)
    x_big = jax.random.normal(kx2, (300, input_size), jnp.float32)
    out_big = jax.block_until_ready(
        stock_price_predictor_forward(x_big, params, compute_dtype=jnp.float32))
    assert out_big.shape == (300, 1)
    assert jnp.allclose(out_big, reference_forward(x_big, params),
                        atol=1e-4, rtol=1e-4), "tiled mismatch"

    print("KERNEL_OK")
</pallas_src>

<mosaic_0001>
module attributes {stable_mosaic.version = 11 : i64} {
  func.func @_mlp_kernel(%arg0: i32, %arg1: memref<128x12xf32, #tpu.memory_space<vmem>>, %arg2: memref<128x12xf32, #tpu.memory_space<vmem>>, %arg3: memref<128x1xf32, #tpu.memory_space<vmem>>, %arg4: memref<64x128xf32, #tpu.memory_space<vmem>>, %arg5: memref<64x1xf32, #tpu.memory_space<vmem>>, %arg6: memref<32x64xf32, #tpu.memory_space<vmem>>, %arg7: memref<32x1xf32, #tpu.memory_space<vmem>>, %arg8: memref<1x32xf32, #tpu.memory_space<vmem>>, %arg9: memref<1x1xf32, #tpu.memory_space<vmem>>, %arg10: memref<1x128xf32, #tpu.memory_space<vmem>>) attributes {dimension_semantics = [#tpu.dimension_semantics<parallel>], iteration_bounds = array<i64: 1>, scalar_prefetch = 0 : i64, scratch_operands = 0 : i64, tpu.core_type = #tpu.core_type<tc>, window_params = [{transform_indices = @transform_0, window_bounds = array<i64: 128, 12>}, {pipeline_mode = #tpu.pipeline_mode<synchronous>, transform_indices = @transform_1, window_bounds = array<i64: 128, 12>}, {pipeline_mode = #tpu.pipeline_mode<synchronous>, transform_indices = @transform_2, window_bounds = array<i64: 128, 1>}, {pipeline_mode = #tpu.pipeline_mode<synchronous>, transform_indices = @transform_3, window_bounds = array<i64: 64, 128>}, {pipeline_mode = #tpu.pipeline_mode<synchronous>, transform_indices = @transform_4, window_bounds = array<i64: 64, 1>}, {pipeline_mode = #tpu.pipeline_mode<synchronous>, transform_indices = @transform_5, window_bounds = array<i64: 32, 64>}, {pipeline_mode = #tpu.pipeline_mode<synchronous>, transform_indices = @transform_6, window_bounds = array<i64: 32, 1>}, {pipeline_mode = #tpu.pipeline_mode<synchronous>, transform_indices = @transform_7, window_bounds = array<i64: 1, 32>}, {pipeline_mode = #tpu.pipeline_mode<synchronous>, transform_indices = @transform_8, window_bounds = array<i64: 1, 1>}, {transform_indices = @transform_9, window_bounds = array<i64: 1, 128>}]} {
    %c0 = arith.constant 0 : index
    %c0_0 = arith.constant 0 : index
    %0 = vector.load %arg2[%c0, %c0_0] : memref<128x12xf32, #tpu.memory_space<vmem>>, vector<128x12xf32>
    %c0_1 = arith.constant 0 : index
    %c0_2 = arith.constant 0 : index
    %1 = vector.load %arg1[%c0_1, %c0_2] : memref<128x12xf32, #tpu.memory_space<vmem>>, vector<128x12xf32>
    %cst = arith.constant dense<0.000000e+00> : vector<128x128xf32>
    %2 = tpu.matmul %0, %1, %cst {dimension_numbers = #tpu.dot_dimension_numbers<[1], [1], [0], [0], [0, 0, 1, 0], [], []>} : vector<128x12xf32>, vector<128x12xf32>, vector<128x128xf32> -> vector<128x128xf32>
    %c0_3 = arith.constant 0 : index
    %c0_4 = arith.constant 0 : index
    %3 = vector.load %arg3[%c0_3, %c0_4] : memref<128x1xf32, #tpu.memory_space<vmem>>, vector<128x1xf32>
    %4 = vector.broadcast %3 : vector<128x1xf32> to vector<128x128xf32>
    %5 = arith.addf %2, %4 : vector<128x128xf32>
    %cst_5 = arith.constant 0.000000e+00 : f32
    %6 = vector.broadcast %cst_5 : f32 to vector<128x128xf32>
    %7 = arith.maximumf %5, %6 : vector<128x128xf32>
    %c0_6 = arith.constant 0 : index
    %c0_7 = arith.constant 0 : index
    %8 = vector.load %arg4[%c0_6, %c0_7] : memref<64x128xf32, #tpu.memory_space<vmem>>, vector<64x128xf32>
    %cst_8 = arith.constant dense<0.000000e+00> : vector<64x128xf32>
    %9 = tpu.matmul %8, %7, %cst_8 {dimension_numbers = #tpu.dot_dimension_numbers<[1], [0], [0], [1], [0, 0, 1, 1], [], []>} : vector<64x128xf32>, vector<128x128xf32>, vector<64x128xf32> -> vector<64x128xf32>
    %c0_9 = arith.constant 0 : index
    %c0_10 = arith.constant 0 : index
    %10 = vector.load %arg5[%c0_9, %c0_10] : memref<64x1xf32, #tpu.memory_space<vmem>>, vector<64x1xf32>
    %11 = vector.broadcast %10 : vector<64x1xf32> to vector<64x128xf32>
    %12 = arith.addf %9, %11 : vector<64x128xf32>
    %cst_11 = arith.constant 0.000000e+00 : f32
    %13 = vector.broadcast %cst_11 : f32 to vector<64x128xf32>
    %14 = arith.maximumf %12, %13 : vector<64x128xf32>
    %c0_12 = arith.constant 0 : index
    %c0_13 = arith.constant 0 : index
    %15 = vector.load %arg6[%c0_12, %c0_13] : memref<32x64xf32, #tpu.memory_space<vmem>>, vector<32x64xf32>
    %cst_14 = arith.constant dense<0.000000e+00> : vector<32x128xf32>
    %16 = tpu.matmul %15, %14, %cst_14 {dimension_numbers = #tpu.dot_dimension_numbers<[1], [0], [0], [1], [0, 0, 1, 1], [], []>} : vector<32x64xf32>, vector<64x128xf32>, vector<32x128xf32> -> vector<32x128xf32>
    %c0_15 = arith.constant 0 : index
    %c0_16 = arith.constant 0 : index
    %17 = vector.load %arg7[%c0_15, %c0_16] : memref<32x1xf32, #tpu.memory_space<vmem>>, vector<32x1xf32>
    %18 = vector.broadcast %17 : vector<32x1xf32> to vector<32x128xf32>
    %19 = arith.addf %16, %18 : vector<32x128xf32>
    %cst_17 = arith.constant 0.000000e+00 : f32
    %20 = vector.broadcast %cst_17 : f32 to vector<32x128xf32>
    %21 = arith.maximumf %19, %20 : vector<32x128xf32>
    %c0_18 = arith.constant 0 : index
    %c0_19 = arith.constant 0 : index
    %22 = vector.load %arg8[%c0_18, %c0_19] : memref<1x32xf32, #tpu.memory_space<vmem>>, vector<1x32xf32>
    %cst_20 = arith.constant dense<0.000000e+00> : vector<1x128xf32>
    %23 = tpu.matmul %22, %21, %cst_20 {dimension_numbers = #tpu.dot_dimension_numbers<[1], [0], [0], [1], [0, 0, 1, 1], [], []>} : vector<1x32xf32>, vector<32x128xf32>, vector<1x128xf32> -> vector<1x128xf32>
    %c0_21 = arith.constant 0 : index
    %c0_22 = arith.constant 0 : index
    %24 = vector.load %arg9[%c0_21, %c0_22] : memref<1x1xf32, #tpu.memory_space<vmem>>, vector<1x1xf32>
    %25 = vector.broadcast %24 : vector<1x1xf32> to vector<1x128xf32>
    %26 = arith.addf %23, %25 : vector<1x128xf32>
    %c0_23 = arith.constant 0 : index
    %c0_24 = arith.constant 0 : index
    %27 = vector.load %arg10[%c0_23, %c0_24] : memref<1x128xf32, #tpu.memory_space<vmem>>, vector<1x128xf32>
    tpu.vector_store %arg10[%c0_23, %c0_24], %26 {strides = array<i32>} : memref<1x128xf32, #tpu.memory_space<vmem>>, vector<1x128xf32>,
    return
  }
  func.func @transform_0(%arg0: i32) -> (i32, i32) {
    %c0_i32 = arith.constant 0 : i32
    %c0_i32_0 = arith.constant 0 : i32
    return %arg0, %c0_i32 : i32, i32
  }
  func.func @transform_1(%arg0: i32) -> (i32, i32) {
    %c0_i32 = arith.constant 0 : i32
    %c0_i32_0 = arith.constant 0 : i32
    %c0_i32_1 = arith.constant 0 : i32
    return %c0_i32, %c0_i32_0 : i32, i32
  }
  func.func @transform_2(%arg0: i32) -> (i32, i32) {
    %c0_i32 = arith.constant 0 : i32
    %c0_i32_0 = arith.constant 0 : i32
    %c0_i32_1 = arith.constant 0 : i32
    return %c0_i32, %c0_i32_0 : i32, i32
  }
  func.func @transform_3(%arg0: i32) -> (i32, i32) {
    %c0_i32 = arith.constant 0 : i32
    %c0_i32_0 = arith.constant 0 : i32
    %c0_i32_1 = arith.constant 0 : i32
    return %c0_i32, %c0_i32_0 : i32, i32
  }
  func.func @transform_4(%arg0: i32) -> (i32, i32) {
    %c0_i32 = arith.constant 0 : i32
    %c0_i32_0 = arith.constant 0 : i32
    %c0_i32_1 = arith.constant 0 : i32
    return %c0_i32, %c0_i32_0 : i32, i32
  }
  func.func @transform_5(%arg0: i32) -> (i32, i32) {
    %c0_i32 = arith.constant 0 : i32
    %c0_i32_0 = arith.constant 0 : i32
    %c0_i32_1 = arith.constant 0 : i32
    return %c0_i32, %c0_i32_0 : i32, i32
  }
  func.func @transform_6(%arg0: i32) -> (i32, i32) {
    %c0_i32 = arith.constant 0 : i32
    %c0_i32_0 = arith.constant 0 : i32
    %c0_i32_1 = arith.constant 0 : i32
    return %c0_i32, %c0_i32_0 : i32, i32
  }
  func.func @transform_7(%arg0: i32) -> (i32, i32) {
    %c0_i32 = arith.constant 0 : i32
    %c0_i32_0 = arith.constant 0 : i32
    %c0_i32_1 = arith.constant 0 : i32
    return %c0_i32, %c0_i32_0 : i32, i32
  }
  func.func @transform_8(%arg0: i32) -> (i32, i32) {
    %c0_i32 = arith.constant 0 : i32
    %c0_i32_0 = arith.constant 0 : i32
    %c0_i32_1 = arith.constant 0 : i32
    return %c0_i32, %c0_i32_0 : i32, i32
  }
  func.func @transform_9(%arg0: i32) -> (i32, i32) {
    %c0_i32 = arith.constant 0 : i32
    %c0_i32_0 = arith.constant 0 : i32
    return %c0_i32, %arg0 : i32, i32
  }
}

</mosaic_0001>

<bundles_post_ra>
// kernel: tpu_custom_call.1
= control target key start
LH: loop header
LB: loop body
LE: loop exit
PB: predicated region body
PF: predicated region fallthrough
CT: control target
= control target key end

     0   :  { %s1543_s0 = inlined_call_operand.vmem [shape: f32[8,12], index: 0, kind: input, shape index: {}]   ;;  %s1544_s1 = inlined_call_operand.vmem [shape: f32[128,12], index: 1, kind: input, shape index: {}]   ;;  %s1545_s2 = inlined_call_operand.vmem [shape: f32[128,1], index: 2, kind: input, shape index: {}]   ;;  %s1546_s3 = inlined_call_operand.vmem [shape: f32[64,128], index: 3, kind: input, shape index: {}]   ;;  %s1547_s4 = inlined_call_operand.vmem [shape: f32[64,1], index: 4, kind: input, shape index: {}]   ;;  %s1548_s5 = inlined_call_operand.vmem [shape: f32[32,64], index: 5, kind: input, shape index: {}]   ;;  %s1549_s6 = inlined_call_operand.vmem [shape: f32[32,1], index: 6, kind: input, shape index: {}]   ;;  %s1550_s7 = inlined_call_operand.vmem [shape: f32[1,32], index: 7, kind: input, shape index: {}]   ;;  %s1551_s8 = inlined_call_operand.<no memory space> [shape: f32[1,1], index: 8, kind: input, shape index: {}]   ;;  %s1552_s9 = inlined_call_operand.hbm [shape: f32[1,8], index: 9, kind: output, shape index: {}]  }
   0x1   :  { %v14_v0 = vstv %s1551_s8 }
   0x2   :  { %15 = vst [vmem:[#allocation2] sm:$0x1] %v14_v0 }
   0x3   :  { %v51_v1 = vld [vmem:[%s1543_s0] sm:$0xff]  ;;  %v52_v2 = vld [vmem:[%s1543_s0 + $0x8] sm:$0xff]  ;;  %vm163_vm0 = vcmask 97280   ;;  %v53_v3 = vld [vmem:[%s1543_s0 + $0x10] sm:$0xff]  ;;  %v1196_v7 = vmov 0  }
   0x4   :  { %v1063_v4 = vpack.c.bf16 %v52_v2, %v51_v1  ;;  %vm1265_vm1 = vmpackc.low %vm163_vm0, %vm163_vm0  ;;  %v54_v6 = vld [vmem:[%s1543_s0 + $0x18] sm:$0xff]  ;;  %1170 = vset.pattern.permute.xlu0 %v1196_v7  ;;  %1171 = vset.pattern.permute.xlu1 %v1196_v7  ;;  %v35_v9 = vld [vmem:[%s1544_s1] sm:$0xff] }
   0x5   :  { %v1069_v8 = vpack.c.bf16 %v54_v6, %v53_v3  ;;  %v55_v10 = vld [vmem:[%s1543_s0 + $0x20] sm:$0xff]  ;;  %v56_v11 = vld [vmem:[%s1543_s0 + $0x28] sm:$0xff]  ;;  %962 = vmatprep.mubr.msk.f32.mxu0 %vm163_vm0, %v35_v9  ;;  %v69_v14 = vld [vmem:[%s1545_s2 + $0x10] sm:$0xff] }
   0x6   :  { %1065 = vmatprep.subr.msk.bf16.mxu0 %vm1265_vm1, %v1063_v4  ;;  %v1075_v12 = vpack.c.bf16 %v56_v11, %v55_v10  ;;  %v67_v13 = vld [vmem:[%s1545_s2] sm:$0xff]  ;;  %v68_v15 = vld [vmem:[%s1545_s2 + $0x8] sm:$0xff]  ;;  %95 = vperm.xlu1 %1171, %v69_v14   ;;  %v70_v16 = vld [vmem:[%s1545_s2 + $0x18] sm:$0xff] }
   0x7   :  { %1068 = vmatpush3.bf16.xpose.msk.msra.mxu0 %vm1265_vm1, %v1063_v4  ;;  %85 = vperm.xlu0 %1170, %v67_v13   ;;  %v57_v17 = vld [vmem:[%s1543_s0 + $0x30] sm:$0xff]  ;;  %v58_v18 = vld [vmem:[%s1543_s0 + $0x38] sm:$0xff]  ;;  %v71_v19 = vld [vmem:[%s1545_s2 + $0x20] sm:$0xff] }
   0x8   :  { %1071 = vmatprep.subr.msk.bf16.mxu0 %vm1265_vm1, %v1069_v8  ;;  %v1081_v20 = vpack.c.bf16 %v58_v18, %v57_v17  ;;  %v72_v21 = vld [vmem:[%s1545_s2 + $0x28] sm:$0xff]  ;;  %v73_v22 = vld [vmem:[%s1545_s2 + $0x30] sm:$0xff] }
   0xa   :  { %100 = vperm.xlu1 %1171, %v70_v16  }
   0xb   :  { %90 = vperm.xlu0 %1170, %v68_v15  }
   0xe   :  { %110 = vperm.xlu1 %1171, %v72_v21  }
   0xf   :  { %1074 = vmatpush3.bf16.xpose.msk.msra.mxu0 %vm1265_vm1, %v1069_v8  ;;  %105 = vperm.xlu0 %1170, %v71_v19  }
  0x10   :  { %1077 = vmatprep.subr.msk.bf16.mxu0 %vm1265_vm1, %v1075_v12 }
  0x17   :  { %1080 = vmatpush3.bf16.xpose.msk.msra.mxu0 %vm1265_vm1, %v1075_v12 }
  0x18   :  { %16 = vsyncpa [#allocation4], 0  ;;  %1083 = vmatprep.subr.msk.bf16.mxu0 %vm1265_vm1, %v1081_v20  ;;  %v74_v23 = vld [vmem:[%s1545_s2 + $0x38] sm:$0xff]  ;;  %v59_v24 = vld [vmem:[%s1543_s0 + $0x40] sm:$0xff]  ;;  %115 = vperm.xlu0 %1170, %v73_v22   ;;  %vm618_vm2 = vcmask 523264   ;;  %vm1198_vm3 = vmmov 0  }
  0x19   :  { %v60_v25 = vld [vmem:[%s1543_s0 + $0x48] sm:$0xff]  ;;  %v75_v26 = vld [vmem:[%s1545_s2 + $0x40] sm:$0xff]  ;;  %120 = vperm.xlu1 %1171, %v74_v23   ;;  %v77_v29 = vld [vmem:[%s1545_s2 + $0x50] sm:$0xff]  ;;  %vm731_vm4 = vcmask 261120  }
  0x1a   :  { %v1087_v27 = vpack.c.bf16 %v60_v25, %v59_v24  ;;  %v76_v28 = vld [vmem:[%s1545_s2 + $0x48] sm:$0xff]  ;;  %v78_v30 = vld [vmem:[%s1545_s2 + $0x58] sm:$0xff]  ;;  %v61_v31 = vld [vmem:[%s1543_s0 + $0x50] sm:$0xff] }
  0x1b   :  { %v62_v32 = vld [vmem:[%s1543_s0 + $0x58] sm:$0xff]  ;;  %v79_v33 = vld [vmem:[%s1545_s2 + $0x60] sm:$0xff]  ;;  %v80_v35 = vld [vmem:[%s1545_s2 + $0x68] sm:$0xff] }
  0x1c   :  { %125 = vperm.xlu0 %1170, %v75_v26   ;;  %v1093_v34 = vpack.c.bf16 %v62_v32, %v61_v31  ;;  %v81_v36 = vld [vmem:[%s1545_s2 + $0x70] sm:$0xff]  ;;  %v82_v37 = vld [vmem:[%s1545_s2 + $0x78] sm:$0xff]  ;;  %v63_v38 = vld [vmem:[%s1543_s0 + $0x60] sm:$0xff]  ;;  %s1200_s2 = smov [#allocation3]  }
  0x1d   :  { %130 = vperm.xlu1 %1171, %v76_v28   ;;  %v64_v39 = vld [vmem:[%s1543_s0 + $0x68] sm:$0xff]  ;;  %v429_v40 = vld [vmem:[%s1547_s4] sm:$0xff]  ;;  %v431_v43 = vld [vmem:[%s1547_s4 + $0x10] sm:$0xff]  ;;  %s812_s11 = sshll.u32 %s1200_s2, 4  ;;  %s813_s11 = int_to_ptr.vmem [resolvable:$true] %s812_s11 }
  0x1e   :  { %v1099_v41 = vpack.c.bf16 %v64_v39, %v63_v38  ;;  %v430_v42 = vld [vmem:[%s1547_s4 + $0x8] sm:$0xff]  ;;  %v432_v44 = vld [vmem:[%s1547_s4 + $0x18] sm:$0xff]  ;;  %v65_v45 = vld [vmem:[%s1543_s0 + $0x70] sm:$0xff]  ;;  %s1172_s12 = scalar_lea.vmem %s813_s11, 16  ;;  %s1176_s13 = scalar_lea.vmem %s813_s11, 32 }
  0x1f   :  { %1086 = vmatpush3.bf16.xpose.msk.msra.mxu0 %vm1265_vm1, %v1081_v20  ;;  %v66_v46 = vld [vmem:[%s1543_s0 + $0x78] sm:$0xff]  ;;  %v433_v47 = vld [vmem:[%s1547_s4 + $0x20] sm:$0xff]  ;;  %v434_v49 = vld [vmem:[%s1547_s4 + $0x28] sm:$0xff]  ;;  %p1173_p0 = scmp.ne.s32.totalorder %s813_s11, %s1172_s12  ;;  %p1177_p1 = scmp.lt.s32.totalorder %s813_s11, %s813_s11 }
  0x20   :  { %1089 = vmatprep.subr.msk.bf16.mxu0 %vm1265_vm1, %v1087_v27  ;;  %135 = vperm.xlu0 %1170, %v77_v29   ;;  %v1105_v48 = vpack.c.bf16 %v66_v46, %v65_v45  ;;  %v435_v50 = vld [vmem:[%s1547_s4 + $0x30] sm:$0xff]  ;;  %v436_v51 = vld [vmem:[%s1547_s4 + $0x38] sm:$0xff]  ;;  %v594_v52 = vld [vmem:[%s1549_s6] sm:$0xff]  ;;  %p1178_p2 = scmp.lt.s32.totalorder %s1176_s13, %s1172_s12 }
  0x21   :  { %140 = vperm.xlu1 %1171, %v78_v30   ;;  %v595_v53 = vld [vmem:[%s1549_s6 + $0x8] sm:$0xff]  ;;  %v596_v54 = vld [vmem:[%s1549_s6 + $0x10] sm:$0xff]  ;;  %v597_v55 = vld [vmem:[%s1549_s6 + $0x18] sm:$0xff] }
  0x22   :  { %v36_v56 = vld [vmem:[%s1544_s1 + $0x8] sm:$0xff]  ;;  %v721_v57 = vld [vmem:[#allocation2] sm:$0x1]  ;;  %v37_v58 = vld [vmem:[%s1544_s1 + $0x10] sm:$0xff]  ;;  %p1179_p3 = por %p1178_p2, %p1177_p1 }
  0x23   :  { %v38_v59 = vld [vmem:[%s1544_s1 + $0x18] sm:$0xff]  ;;  %v39_v60 = vld [vmem:[%s1544_s1 + $0x20] sm:$0xff]  ;;  %v40_v61 = vld [vmem:[%s1544_s1 + $0x28] sm:$0xff] }
  0x24   :  { %145 = vperm.xlu0 %1170, %v79_v33   ;;  %v41_v62 = vld [vmem:[%s1544_s1 + $0x30] sm:$0xff]  ;;  %v42_v63 = vld [vmem:[%s1544_s1 + $0x38] sm:$0xff]  ;;  %v43_v0 = vld [vmem:[%s1544_s1 + $0x40] sm:$0xff]  ;;  %p1180_p4 = pnand %p1179_p3, %p1173_p0 }
  0x25   :  { %150 = vperm.xlu1 %1171, %v80_v35   ;;  %v44_v1 = vld [vmem:[%s1544_s1 + $0x48] sm:$0xff]  ;;  %v45_v2 = vld [vmem:[%s1544_s1 + $0x50] sm:$0xff]  ;;  %v46_v3 = vld [vmem:[%s1544_s1 + $0x58] sm:$0xff] }
  0x26   :  { %v47_v4 = vld [vmem:[%s1544_s1 + $0x60] sm:$0xff]  ;;  %v48_v5 = vld [vmem:[%s1544_s1 + $0x68] sm:$0xff]  ;;  %v49_v6 = vld [vmem:[%s1544_s1 + $0x70] sm:$0xff] }
  0x27   :  { %1092 = vmatpush3.bf16.xpose.msk.msra.mxu0 %vm1265_vm1, %v1087_v27  ;;  %v50_v7 = vld [vmem:[%s1544_s1 + $0x78] sm:$0xff]  ;;  %v421_v8 = vld [vmem:[%s1546_s3] sm:$0xff] }
  0x28   :  { %1095 = vmatprep.subr.msk.bf16.mxu0 %vm1265_vm1, %v1093_v34  ;;  %155 = vperm.xlu0 %1170, %v81_v36  }
  0x29   :  { %160 = vperm.xlu1 %1171, %v82_v37   ;;  %1018 = vmatprep.mubr.f32.mxu1 %v421_v8 }
  0x2c   :  { %439 = vperm.xlu0 %1170, %v429_v40  }
  0x2d   :  { %444 = vperm.xlu1 %1171, %v430_v42  }
  0x2f   :  { %1098 = vmatpush3.bf16.xpose.msk.msra.mxu0 %vm1265_vm1, %v1093_v34 }
  0x30   :  { %1101 = vmatprep.subr.msk.bf16.mxu0 %vm1265_vm1, %v1099_v41  ;;  %449 = vperm.xlu0 %1170, %v431_v43  }
  0x31   :  { %454 = vperm.xlu1 %1171, %v432_v44  }
  0x34   :  { %459 = vperm.xlu0 %1170, %v433_v47  }
  0x35   :  { %464 = vperm.xlu1 %1171, %v434_v49  }
  0x37   :  { %1104 = vmatpush3.bf16.xpose.msk.msra.mxu0 %vm1265_vm1, %v1099_v41 }
  0x38   :  { %1107 = vmatprep.subr.msk.bf16.mxu0 %vm1265_vm1, %v1105_v48  ;;  %469 = vperm.xlu0 %1170, %v435_v50  }
  0x39   :  { %474 = vperm.xlu1 %1171, %v436_v51  }
  0x3c   :  { %600 = vperm.xlu0 %1170, %v594_v52  }
  0x3d   :  { %605 = vperm.xlu1 %1171, %v595_v53  }
  0x3f   :  { %1110 = vmatpush3.bf16.xpose.msk.msra.mxu0 %vm1265_vm1, %v1105_v48 }
  0x40   :  { %610 = vperm.xlu0 %1170, %v596_v54  }
  0x41   :  { %615 = vperm.xlu1 %1171, %v597_v55  }
  0x44   :  { %724 = vperm.xlu0 %1170, %v721_v57  }
  0x46   :  { %963 = vmatmul.mubr.msk.f32.vlgmr.msra.gmra.mrb[0].mxu0 %vm163_vm0, %v36_v56 }
  0x47   :  { %965 = vmatprep.mubr.msk.f32.mxu0 %vm163_vm0, %v37_v58 }
  0x4a   :  { %966 = vmatmul.mubr.msk.f32.gmra.mrb[2].mxu0 %vm163_vm0, %v38_v59 }
  0x4b   :  { %968 = vmatprep.mubr.msk.f32.mxu0 %vm163_vm0, %v39_v60 }
  0x4e   :  { %969 = vmatmul.mubr.msk.f32.gmra.mrb[4].mxu0 %vm163_vm0, %v40_v61 }
  0x4f   :  { %971 = vmatprep.mubr.msk.f32.mxu0 %vm163_vm0, %v41_v62 }
  0x52   :  { %972 = vmatmul.mubr.msk.f32.gmra.mrb[6].mxu0 %vm163_vm0, %v42_v63 }
  0x53   :  { %974 = vmatprep.mubr.msk.f32.mxu0 %vm163_vm0, %v43_v0 }
  0x56   :  { %975 = vmatmul.mubr.msk.f32.gmra.mrb[8].mxu0 %vm163_vm0, %v44_v1 }
  0x57   :  { %977 = vmatprep.mubr.msk.f32.mxu0 %vm163_vm0, %v45_v2 }
  0x5a   :  { %978 = vmatmul.mubr.msk.f32.gmra.mrb[10].mxu0 %vm163_vm0, %v46_v3 }
  0x5b   :  { %980 = vmatprep.mubr.msk.f32.mxu0 %vm163_vm0, %v47_v4 }
  0x5e   :  { %981 = vmatmul.mubr.msk.f32.gmra.mrb[12].mxu0 %vm163_vm0, %v48_v5 }
  0x5f   :  { %983 = vmatprep.mubr.msk.f32.mxu0 %vm163_vm0, %v49_v6 }
  0x62   :  { %984 = vmatmul.mubr.msk.f32.gmra.mrb[14].mxu0 %vm163_vm0, %v50_v7 }
  0x85   :  { %v96_v9 = vpop.permute.xlu1 %95 }
  0x86   :  { %v86_v10 = vpop.permute.xlu0 %85 }
  0x89   :  { %v101_v11 = vpop.permute.xlu1 %100 }
  0x8a   :  { %v91_v12 = vpop.permute.xlu0 %90 }
  0x8d   :  { %v111_v13 = vpop.permute.xlu1 %110 }
  0x8e   :  { %v106_v14 = vpop.permute.xlu0 %105 }
  0x97   :  { %v116_v23 = vpop.permute.xlu0 %115 }
  0x98   :  { %v121_v20 = vpop.permute.xlu1 %120 }
  0x9b   :  { %v126_v36 = vpop.permute.xlu0 %125 }
  0x9c   :  { %v131_v33 = vpop.permute.xlu1 %130 }
  0x9f   :  { %v136_v48 = vpop.permute.xlu0 %135 }
  0xa0   :  { %v141_v45 = vpop.permute.xlu1 %140 }
  0xa3   :  { %v146_v61 = vpop.permute.xlu0 %145 }
  0xa4   :  { %v151_v58 = vpop.permute.xlu1 %150 }
  0xa8   :  { %v161_v6 = vpop.permute.xlu1 %160 }
 0x119   :  { %v964_v15 = vpop.f32.mrb[0].mxu0 }
 0x11a   :  { %v332_v16 = vadd.f32 %v964_v15, %v91_v12  ;;  %v326_v17 = vpop.f32.mrb[1].mxu0 }
 0x11b   :  { %v327_v18 = vadd.f32 %v326_v17, %v86_v10  ;;  %v422_v17 = vld [vmem:[%s1546_s3 + $0x8] sm:$0xff] }
 0x11c   :  { %v406_v19 = vmax.f32 %v332_v16, 0.0 }
 0x11d   :  { %v405_v21 = vmax.f32 %v327_v18, 0.0  ;;  %v967_v22 = vpop.f32.mrb[2].mxu0  ;;  %v423_v18 = vld [vmem:[%s1546_s3 + $0x10] sm:$0xff] }
 0x11e   :  { %v342_v24 = vadd.f32 %v967_v22, %v101_v11  ;;  %v336_v25 = vpop.f32.mrb[3].mxu0  ;;  %v427_v22 = vld [vmem:[%s1546_s3 + $0x30] sm:$0xff] }
 0x11f   :  { %v337_v26 = vadd.f32 %v336_v25, %v96_v9  ;;  %v1111_v27 = vpack.c.bf16 %v406_v19, %v405_v21  ;;  %v156_v9 = vpop.permute.xlu0 %155  ;;  %v424_v19 = vld [vmem:[%s1546_s3 + $0x18] sm:$0xff]  ;;  %v426_v21 = vld [vmem:[%s1546_s3 + $0x28] sm:$0xff]  ;;  %v445_v25 = vpop.permute.xlu1 %444 }
 0x120   :  { %v408_v28 = vmax.f32 %v342_v24, 0.0  ;;  %v590_v24 = vld [vmem:[%s1548_s5] sm:$0xff] }
 0x121   :  { %v407_v29 = vmax.f32 %v337_v26, 0.0  ;;  %v970_v30 = vpop.f32.mrb[4].mxu0  ;;  %1112 = vmatprep.subr.bf16.mxu1 %v1111_v27 }
 0x122   :  { %v352_v31 = vadd.f32 %v970_v30, %v111_v13  ;;  %v346_v32 = vpop.f32.mrb[5].mxu0  ;;  %1114 = vmatpush3.bf16.msra.mxu1 %v1111_v27 }
 0x123   :  { %v1115_v34 = vpack.c.bf16 %v408_v28, %v407_v29  ;;  %v347_v35 = vadd.f32 %v346_v32, %v106_v14  ;;  %v440_v26 = vpop.permute.xlu0 %439  ;;  %v455_v27 = vpop.permute.xlu1 %454 }
 0x124   :  { %v410_v37 = vmax.f32 %v352_v31, 0.0 }
 0x125   :  { %v409_v38 = vmax.f32 %v347_v35, 0.0  ;;  %v973_v39 = vpop.f32.mrb[6].mxu0  ;;  %1116 = vmatprep.subr.bf16.mxu1 %v1115_v34 }
 0x126   :  { %v362_v40 = vadd.f32 %v973_v39, %v121_v20  ;;  %v356_v41 = vpop.f32.mrb[7].mxu0  ;;  %1118 = vmatpush3.bf16.msra.mxu1 %v1115_v34  ;;  %v425_v20 = vld [vmem:[%s1546_s3 + $0x20] sm:$0xff] }
 0x127   :  { %v1119_v42 = vpack.c.bf16 %v410_v37, %v409_v38  ;;  %v357_v43 = vadd.f32 %v356_v41, %v116_v23  ;;  %v428_v23 = vld [vmem:[%s1546_s3 + $0x38] sm:$0xff]  ;;  %v450_v29 = vpop.permute.xlu0 %449  ;;  %v465_v38 = vpop.permute.xlu1 %464 }
 0x128   :  { %v412_v44 = vmax.f32 %v362_v40, 0.0 }
 0x129   :  { %v411_v46 = vmax.f32 %v357_v43, 0.0  ;;  %v976_v47 = vpop.f32.mrb[8].mxu0  ;;  %1120 = vmatprep.subr.bf16.mxu1 %v1119_v42 }
 0x12a   :  { %v372_v49 = vadd.f32 %v976_v47, %v131_v33  ;;  %v366_v50 = vpop.f32.mrb[9].mxu0  ;;  %1122 = vmatpush3.bf16.msra.mxu1 %v1119_v42 }
 0x12b   :  { %v1123_v51 = vpack.c.bf16 %v412_v44, %v411_v46  ;;  %v367_v52 = vadd.f32 %v366_v50, %v126_v36  ;;  %v460_v41 = vpop.permute.xlu0 %459  ;;  %v475_v50 = vpop.permute.xlu1 %474 }
 0x12c   :  { %v414_v53 = vmax.f32 %v372_v49, 0.0 }
 0x12d   :  { %v413_v54 = vmax.f32 %v367_v52, 0.0  ;;  %v979_v55 = vpop.f32.mrb[10].mxu0  ;;  %1124 = vmatprep.subr.bf16.mxu1 %v1123_v51 }
 0x12e   :  { %v382_v56 = vadd.f32 %v979_v55, %v141_v45  ;;  %v376_v57 = vpop.f32.mrb[11].mxu0  ;;  %1126 = vmatpush3.bf16.msra.mxu1 %v1123_v51 }
 0x12f   :  { %v1127_v59 = vpack.c.bf16 %v414_v53, %v413_v54  ;;  %v377_v60 = vadd.f32 %v376_v57, %v136_v48  ;;  %v470_v53 = vpop.permute.xlu0 %469 }
 0x130   :  { %v416_v62 = vmax.f32 %v382_v56, 0.0 }
 0x131   :  { %v415_v63 = vmax.f32 %v377_v60, 0.0  ;;  %v982_v0 = vpop.f32.mrb[12].mxu0  ;;  %1128 = vmatprep.subr.bf16.mxu1 %v1127_v59 }
 0x132   :  { %v392_v1 = vadd.f32 %v982_v0, %v151_v58  ;;  %v386_v2 = vpop.f32.mrb[13].mxu0  ;;  %1130 = vmatpush3.bf16.msra.mxu1 %v1127_v59  ;;  %v1197_v0 = vmov 0.0|0.0  }
 0x133   :  { %v1131_v3 = vpack.c.bf16 %v416_v62, %v415_v63  ;;  %v387_v4 = vadd.f32 %v386_v2, %v146_v61  ;;  %v591_v61 = vld [vmem:[%s1548_s5 + $0x8] sm:$0xff]  ;;  %v592_v62 = vld [vmem:[%s1548_s5 + $0x10] sm:$0xff]  ;;  %v593_v63 = vld [vmem:[%s1548_s5 + $0x18] sm:$0xff]  ;;  %v606_v2 = vpop.permute.xlu1 %605 }
 0x134   :  { %v418_v5 = vmax.f32 %v392_v1, 0.0  ;;  %v1199_v1 = vmov 0.0  }
 0x135   :  { %v417_v7 = vmax.f32 %v387_v4, 0.0  ;;  %v985_v8 = vpop.f32.mrb[14].mxu0  ;;  %1132 = vmatprep.subr.bf16.mxu1 %v1131_v3 }
 0x136   :  { %v402_v10 = vadd.f32 %v985_v8, %v161_v6  ;;  %v396_v11 = vpop.f32.mrb[15].mxu0  ;;  %1134 = vmatpush3.bf16.msra.mxu1 %v1131_v3  ;;  %v601_v3 = vpop.permute.xlu0 %600 }
 0x137   :  { %v1135_v12 = vpack.c.bf16 %v418_v5, %v417_v7  ;;  %v397_v13 = vadd.f32 %v396_v11, %v156_v9  ;;  %v616_v9 = vpop.permute.xlu1 %615 }
 0x138   :  { %v420_v14 = vmax.f32 %v402_v10, 0.0 }
 0x139   :  { %v419_v15 = vmax.f32 %v397_v13, 0.0  ;;  %1136 = vmatprep.subr.bf16.mxu1 %v1135_v12 }
 0x13a   :  { %1138 = vmatpush3.bf16.msra.mxu1 %v1135_v12  ;;  %v611_v12 = vpop.permute.xlu0 %610 }
 0x13b   :  { %v1139_v16 = vpack.c.bf16 %v420_v14, %v419_v15 }
 0x13d   :  { %1140 = vmatprep.subr.bf16.mxu1 %v1139_v16 }
 0x13e   :  { %1142 = vmatpush3.bf16.msra.mxu1 %v1139_v16 }
 0x141   :  { %1019 = vmatmul.mubr.f32.vlgmr.msra.gmra.mrb[0].mxu1 %v422_v17 }
 0x142   :  { %1021 = vmatprep.mubr.f32.mxu1 %v423_v18 }
 0x145   :  { %1022 = vmatmul.mubr.f32.gmra.mrb[2].mxu1 %v424_v19 }
 0x146   :  { %1024 = vmatprep.mubr.f32.mxu1 %v425_v20  ;;  %v720_v20 = vld [vmem:[%s1550_s7] sm:$0x1] }
 0x149   :  { %1025 = vmatmul.mubr.f32.gmra.mrb[4].mxu1 %v426_v21  ;;  %v727_v21 = vlaneseq }
 0x14a   :  { %1027 = vmatprep.mubr.f32.mxu1 %v427_v22 }
 0x14b   :  { %v728_v22 = vshrl.u32 %v727_v21, 7 }
 0x14d   :  { %1028 = vmatmul.mubr.f32.gmra.mrb[6].mxu1 %v428_v23  ;;  %v729_v23 = vsub.s32 0, %v728_v22 }
 0x14e   :  { %1046 = vmatprep.mubr.msk.f32.mxu1 %vm618_vm2, %v590_v24  ;;  %v725_v24 = vpop.permute.xlu0 %724 }
 0x214   :  { %v1020_v28 = vpop.f32.mrb[0].mxu1 }
 0x215   :  { %v549_v30 = vadd.f32 %v1020_v28, %v445_v25  ;;  %v543_v31 = vpop.f32.mrb[1].mxu1  ;;  %v730_v25 = vrot.slane %v725_v24, %v729_v23 }
 0x216   :  { %v544_v32 = vadd.f32 %v543_v31, %v440_v26 }
 0x217   :  { %v583_v33 = vmax.f32 %v549_v30, 0.0 }
 0x218   :  { %v582_v34 = vmax.f32 %v544_v32, 0.0  ;;  %v1023_v35 = vpop.f32.mrb[2].mxu1 }
 0x219   :  { %v559_v36 = vadd.f32 %v1023_v35, %v455_v27  ;;  %v553_v37 = vpop.f32.mrb[3].mxu1 }
 0x21a   :  { %v1143_v39 = vpack.c.bf16 %v583_v33, %v582_v34  ;;  %v554_v40 = vadd.f32 %v553_v37, %v450_v29 }
 0x21b   :  { %v585_v42 = vmax.f32 %v559_v36, 0.0 }
 0x21c   :  { %v584_v43 = vmax.f32 %v554_v40, 0.0  ;;  %v1026_v44 = vpop.f32.mrb[4].mxu1  ;;  %1144 = vmatprep.subr.bf16.mxu1 %v1143_v39 }
 0x21d   :  { %v569_v45 = vadd.f32 %v1026_v44, %v465_v38  ;;  %v563_v46 = vpop.f32.mrb[5].mxu1  ;;  %1146 = vmatpush3.bf16.msra.mxu1 %v1143_v39 }
 0x21e   :  { %v1147_v47 = vpack.c.bf16 %v585_v42, %v584_v43  ;;  %v564_v48 = vadd.f32 %v563_v46, %v460_v41 }
 0x21f   :  { %v587_v49 = vmax.f32 %v569_v45, 0.0 }
 0x220   :  { %v586_v51 = vmax.f32 %v564_v48, 0.0  ;;  %v1029_v52 = vpop.f32.mrb[6].mxu1  ;;  %1148 = vmatprep.subr.bf16.mxu1 %v1147_v47 }
 0x221   :  { %v579_v54 = vadd.f32 %v1029_v52, %v475_v50  ;;  %v573_v55 = vpop.f32.mrb[7].mxu1  ;;  %1150 = vmatpush3.bf16.msra.mxu1 %v1147_v47 }
 0x222   :  { %v1151_v56 = vpack.c.bf16 %v587_v49, %v586_v51  ;;  %v574_v57 = vadd.f32 %v573_v55, %v470_v53 }
 0x223   :  { %v589_v58 = vmax.f32 %v579_v54, 0.0 }
 0x224   :  { %v588_v59 = vmax.f32 %v574_v57, 0.0  ;;  %1152 = vmatprep.subr.bf16.mxu1 %v1151_v56 }
 0x225   :  { %1154 = vmatpush3.bf16.msra.mxu1 %v1151_v56 }
 0x226   :  { %v1155_v60 = vpack.c.bf16 %v589_v58, %v588_v59 }
 0x228   :  { %1156 = vmatprep.subr.bf16.mxu1 %v1155_v60 }
 0x229   :  { %1158 = vmatpush3.bf16.msra.mxu1 %v1155_v60 }
 0x22a   :  { %1159 = vmatprep.subr.bf16.mxu1 %v1197_v0 }
 0x22c   :  { %1047 = vmatmul.mubr.msk.f32.vlgmr.msra.gmra.mrb[8].mxu1 %vm618_vm2, %v591_v61 }
 0x22d   :  { %1049 = vmatprep.mubr.msk.f32.mxu1 %vm618_vm2, %v592_v62 }
 0x230   :  { %1050 = vmatmul.mubr.msk.f32.gmra.mrb[10].mxu1 %vm618_vm2, %v593_v63 }
 0x231   :  { %1060 = vmatprep.mubr.msk.f32.mxu1 %vm1198_vm3, %v1199_v1 }
 0x2ff   :  { %v1048_v4 = vpop.f32.mrb[8].mxu1 }
 0x300   :  { %v703_v5 = vadd.f32 %v1048_v4, %v606_v2  ;;  %v697_v6 = vpop.f32.mrb[9].mxu1 }
 0x301   :  { %v698_v7 = vadd.f32 %v697_v6, %v601_v3 }
 0x302   :  { %v717_v8 = vmax.f32 %v703_v5, 0.0 }
 0x303   :  { %v716_v10 = vmax.f32 %v698_v7, 0.0  ;;  %v1051_v11 = vpop.f32.mrb[10].mxu1 }
 0x304   :  { %v713_v13 = vadd.f32 %v1051_v11, %v616_v9  ;;  %v707_v14 = vpop.f32.mrb[11].mxu1 }
 0x305   :  { %v1160_v15 = vpack.c.bf16 %v717_v8, %v716_v10  ;;  %v708_v16 = vadd.f32 %v707_v14, %v611_v12 }
 0x306   :  { %v719_v17 = vmax.f32 %v713_v13, 0.0 }
 0x307   :  { %v718_v18 = vmax.f32 %v708_v16, 0.0  ;;  %1161 = vmatpush3.bf16.msra.mxu1 %v1160_v15 }
 0x308   :  { %1162 = vmatprep.subr.bf16.mxu1 %v1197_v0 }
 0x309   :  { %v1163_v19 = vpack.c.bf16 %v719_v17, %v718_v18 }
 0x30b   :  { %1164 = vmatpush3.bf16.msra.mxu1 %v1163_v19 }
 0x30e   :  { %1061 = vmatmul.mubr.msk.f32.vlgmr.msra.gmra.mrb[12].mxu1 %vm731_vm4, %v720_v20 }
 0x3e1   :  { %v801_v26 = vpop.f32.mrb[12].mxu1 }
 0x3e2   :  { %v802_v27 = vadd.f32 %v801_v26, %v730_v25  ;;  %v1062_v28 = vpop.f32.mrb[13].mxu1 }
 0x3e4   :  { %805 = vst [vmem:[#allocation3] sm:$0x1] %v802_v27 }
 0x3e5   :  { %1183 = shalt.err (!%p1180_p4)
}
 0x3e6   :  { %s1184_s1 = scalar_lea.hbm %s1552_s9, 16 }
 0x3e7   :  { %p1185_p5 = scmp.ne.s32.totalorder %s1552_s9, %s1184_s1  ;;  %p1188_p6 = scmp.lt.u32.totalorder %s1184_s1, %s1552_s9 }
 0x3e9   :  { %p1190_p7 = pnand %p1188_p6, %p1185_p5 }
 0x3eb   :  { %1193 = shalt.err (!%p1190_p7)
}
 0x3ec   :  { %815 = dma.vmem_to_hbm [thread:$0]  %s813_s11, 16, %s1552_s9, [#allocation4]  }
 0x3ed   :  { %1194 = dma.done.wait [#allocation4], 16  }
 0x3ee   :  { %1195 = vsyncadd [#allocation4], 4294967280 }
 0x3ef   :  { %819 = vsyncpa [#allocation4], 1 }

</bundles_post_ra>
